<compile_context>
chip_gen: v6e
topology: v6e:2x2x1
jax: 0.10.0
libtpu: 0.0.40
codegen_flags: <defaults>
</compile_context>

<pallas_src>
import functools

import jax
import jax.numpy as jnp
from jax.experimental import pallas as pl
from jax.experimental.pallas import tpu as pltpu

_SUBLANES = 8
_LANES = 128


def _seg_reduce(x, seg, op):
    """Exact per-contiguous-lane-segment reduction of x (rows of k segments of
    width `seg`), broadcast back to x.shape. Pure VPU/XLU, no MXU precision
    concerns; the k-term loop is unrolled at trace time (k <= 16)."""
    rows, width = x.shape
    k = width // seg
    parts = []
    for j in range(k):
        r = op(x[:, j * seg:(j + 1) * seg], axis=1, keepdims=True)   # (rows, 1)
        parts.append(jnp.broadcast_to(r, (rows, seg)))
    return jnp.concatenate(parts, axis=1)


def _wrong_loss_kernel(pred_ref, target_ref, out_ref, *, tile_rows, n_rows,
                       seg_size, mask_rows):
    """One (tile_rows, row_len) block -> per-tile partial KL sum at out[0, 0]."""
    pred = pred_ref[...].astype(jnp.float32)
    tgt = target_ref[...].astype(jnp.float32)

    if mask_rows:
        # Only the last tile can be ragged: zero target rows past the true batch
        # so they contribute exactly 0 (pred garbage is masked by `pos` below).
        row_start = pl.program_id(0) * tile_rows
        row_idx = jax.lax.broadcasted_iota(jnp.int32, (tile_rows, 1), 0)
        tgt = jnp.where(row_start + row_idx < n_rows, tgt, 0.0)

    if seg_size is not None:
        # Lane-packed small-C path: each 128-lane row carries k = 128//C rows.
        tar_sum = _seg_reduce(tgt, seg_size, jnp.sum)
        m = _seg_reduce(pred, seg_size, jnp.max)
        shifted = pred - m
        lse = jnp.log(_seg_reduce(jnp.exp(shifted), seg_size, jnp.sum))
    else:
        tar_sum = jnp.sum(tgt, axis=1, keepdims=True)
        m = jnp.max(pred, axis=1, keepdims=True)
        shifted = pred - m
        lse = jnp.log(jnp.sum(jnp.exp(shifted), axis=1, keepdims=True))

    # tar = target / sum(target), zero-sum rows clamped to 1e-6 (torch semantics).
    tar_sum = jnp.where(tar_sum == 0.0, jnp.float32(1e-6), tar_sum)
    tar = tgt * pl.reciprocal(tar_sum, approx=False)
    log_sm = shifted - lse

    # F.kl_div pointwise: tar * (log(tar) - log_softmax), defined as 0 at tar<=0.
    pos = tar > 0.0
    pointwise = jnp.where(pos, tar * (jnp.log(jnp.where(pos, tar, 1.0)) - log_sm),
                          0.0)

    # Per-row sums first, then across rows (bounds f32 accumulation error).
    partial = jnp.sum(jnp.sum(pointwise, axis=1, keepdims=True))

    # Partial at [0, 0] of a lane-aligned (8, 128) block, zeros elsewhere, so the
    # wrapper can reduce with a plain jnp.sum.
    r = jax.lax.broadcasted_iota(jnp.int32, (_SUBLANES, _LANES), 0)
    c = jax.lax.broadcasted_iota(jnp.int32, (_SUBLANES, _LANES), 1)
    out_ref[...] = jnp.where((r == 0) & (c == 0), partial, 0.0)


def _pick_tile_rows(n_rows, row_len, bytes_per_elem_in):
    """Row-tile size + scoped-VMEM limit (modest blocks, many grid steps)."""
    # ~256K elements per block (~1 MiB per f32 intermediate) already sits near
    # the HBM roofline; bigger tiles only add VMEM/vreg pressure & shrink grid.
    target_elems = 256 * 1024
    tile = max(_SUBLANES, (target_elems // max(1, row_len)) // _SUBLANES * _SUBLANES)

    # Keep >= ~4 row tiles when possible so the "parallel" grid axis can shard
    # across both v7x TensorCores and pipelining stays fine grained.
    cap = (pl.cdiv(n_rows, 4) // _SUBLANES) * _SUBLANES
    if cap >= _SUBLANES:
        tile = min(tile, cap)

    if n_rows <= _SUBLANES:
        tile = n_rows                        # full-extent block is always legal
    else:
        tile = min(tile, (n_rows // _SUBLANES) * _SUBLANES)

    # VMEM: 2 inputs x 2 pipeline buffers (real dtype) + ~8 tile-sized f32
    # intermediates from the multi-pass log-softmax + slack; keep <= 32 MiB.
    block_elems = tile * row_len
    need = 2 * block_elems * bytes_per_elem_in + 8 * block_elems * 4 + (4 << 20)
    vmem_limit = int(min(32 << 20, max(16 << 20, need)))
    return int(tile), vmem_limit


def wrong_loss(pred_score, target_score):
    """Pallas implementation of wrong_loss.forward. Returns a scalar f32.

    Inputs may be f32 or bf16; the kernel upcasts to f32 internally."""
    assert pred_score.shape == target_score.shape
    assert pred_score.ndim == 2, "expected (N, C) inputs"
    n, c = pred_score.shape

    # Small-C lane packing: view (N, C) as (N//k, k*C) — a free row-major
    # reshape — so each 128-lane vreg row carries k real rows.
    seg_size = None
    n_eff, row_len = n, c
    pred_in, tgt_in = pred_score, target_score
    if c < _LANES and c >= 8 and _LANES % c == 0:
        k = _LANES // c
        if n % k == 0 and n >= k:
            seg_size = c
            n_eff, row_len = n // k, _LANES
            pred_in = pred_score.reshape(n_eff, row_len)
            tgt_in = target_score.reshape(n_eff, row_len)

    bytes_per_elem_in = pred_in.dtype.itemsize + tgt_in.dtype.itemsize
    tile_rows, vmem_limit = _pick_tile_rows(n_eff, row_len, bytes_per_elem_in)
    grid = pl.cdiv(n_eff, tile_rows)
    mask_rows = (n_eff % tile_rows) != 0

    kernel = functools.partial(
        _wrong_loss_kernel, tile_rows=tile_rows, n_rows=n_eff,
        seg_size=seg_size, mask_rows=mask_rows)

    in_bytes = n * c * bytes_per_elem_in
    cost = pl.CostEstimate(
        flops=12 * n * c,
        transcendentals=2 * n * c,
        bytes_accessed=in_bytes + grid * _SUBLANES * _LANES * 4,
    )

    partials = pl.pallas_call(
        kernel,
        out_shape=jax.ShapeDtypeStruct((grid * _SUBLANES, _LANES), jnp.float32),
        grid_spec=pltpu.PrefetchScalarGridSpec(
            num_scalar_prefetch=0,
            grid=(grid,),
            in_specs=[
                pl.BlockSpec((tile_rows, row_len), lambda i: (i, 0)),
                pl.BlockSpec((tile_rows, row_len), lambda i: (i, 0)),
            ],
            out_specs=pl.BlockSpec((_SUBLANES, _LANES), lambda i: (i, 0)),
        ),
        compiler_params=pltpu.CompilerParams(
            dimension_semantics=("parallel",),  # independent row tiles -> megacore
            vmem_limit_bytes=vmem_limit,
        ),
        cost_estimate=cost,
    )(pred_in, tgt_in)

    # mean over N*C elements then *C  ==  total_sum / N  (N = original batch).
    return jnp.sum(partials) / jnp.float32(n)


def _reference(pred, target):
    tar_sum = jnp.sum(target, axis=1, keepdims=True)
    tar_sum = jnp.where(tar_sum == 0.0, 1e-6, tar_sum)
    tar = target / tar_sum
    log_sm = jax.nn.log_softmax(pred, axis=1)
    pw = jnp.where(
        tar > 0.0, tar * (jnp.log(jnp.where(tar > 0.0, tar, 1.0)) - log_sm), 0.0
    )
    return jnp.mean(pw) * pred.shape[1]


if __name__ == "__main__":
    key = jax.random.PRNGKey(0)
    ks = jax.random.split(key, 6)

    # Case 1: (8, 32), one all-zero target row -> lane-packed path (k=4, Np=2),
    # single grid step, exercises the tar_sum == 0 clamp.
    N, C = 8, 32
    pred = jax.random.normal(ks[0], (N, C), dtype=jnp.float32)
    target = jnp.abs(jax.random.normal(ks[1], (N, C), dtype=jnp.float32))
    target = target.at[3].set(0.0)
    loss = wrong_loss(pred, target)
    jax.block_until_ready(loss)
    ref = _reference(pred, target)
    assert jnp.allclose(loss, ref, rtol=1e-5, atol=1e-5), (loss, ref)

    # Case 2: ragged batch (13, 32) -> packing disabled (13 % 4 != 0),
    # multi-tile grid with the in-kernel ragged-row mask.
    N2, C2 = 13, 32
    pred2 = jax.random.normal(ks[2], (N2, C2), dtype=jnp.float32)
    target2 = jnp.abs(jax.random.normal(ks[3], (N2, C2), dtype=jnp.float32))
    loss2 = wrong_loss(pred2, target2)
    jax.block_until_ready(loss2)
    ref2 = _reference(pred2, target2)
    assert jnp.allclose(loss2, ref2, rtol=1e-5, atol=1e-5), (loss2, ref2)

    # Case 3: (256, 32) -> lane-packed path with a multi-tile "parallel" grid
    # (min-grid cap gives 4 tiles of 16 packed rows), mask skipped at trace time.
    N3, C3 = 256, 32
    pred3 = jax.random.normal(ks[4], (N3, C3), dtype=jnp.float32)
    target3 = jnp.abs(jax.random.normal(ks[5], (N3, C3), dtype=jnp.float32))
    loss3 = wrong_loss(pred3, target3)
    jax.block_until_ready(loss3)
    ref3 = _reference(pred3, target3)
    assert jnp.allclose(loss3, ref3, rtol=1e-5, atol=1e-5), (loss3, ref3)

    print("KERNEL_OK")
</pallas_src>

<mosaic_0001>
module attributes {stable_mosaic.version = 11 : i64} {
  func.func @_wrong_loss_kernel(%arg0: i32, %arg1: memref<2x128xf32, #tpu.memory_space<vmem>>, %arg2: memref<2x128xf32, #tpu.memory_space<vmem>>, %arg3: memref<8x128xf32, #tpu.memory_space<vmem>>) attributes {dimension_semantics = [#tpu.dimension_semantics<parallel>], iteration_bounds = array<i64: 1>, scalar_prefetch = 0 : i64, scratch_operands = 0 : i64, tpu.core_type = #tpu.core_type<tc>, window_params = [{transform_indices = @transform_0, window_bounds = array<i64: 2, 128>}, {transform_indices = @transform_1, window_bounds = array<i64: 2, 128>}, {transform_indices = @transform_2, window_bounds = array<i64: 8, 128>}]} {
    %c0 = arith.constant 0 : index
    %c0_0 = arith.constant 0 : index
    %0 = vector.load %arg1[%c0, %c0_0] : memref<2x128xf32, #tpu.memory_space<vmem>>, vector<2x128xf32>
    %c0_1 = arith.constant 0 : index
    %c0_2 = arith.constant 0 : index
    %1 = vector.load %arg2[%c0_1, %c0_2] : memref<2x128xf32, #tpu.memory_space<vmem>>, vector<2x128xf32>
    %2 = vector.extract_strided_slice %1 {offsets = [0, 0], sizes = [2, 32], strides = [1, 1]} : vector<2x128xf32> to vector<2x32xf32>
    %cst = arith.constant dense<0.000000e+00> : vector<2xf32>
    %3 = vector.multi_reduction <add>, %2, %cst [1] : vector<2x32xf32> to vector<2xf32>
    %4 = vector.shape_cast %3 : vector<2xf32> to vector<2x1xf32>
    %5 = vector.shape_cast %4 : vector<2x1xf32> to vector<2x1xf32>
    %6 = vector.broadcast %5 : vector<2x1xf32> to vector<2x32xf32>
    %7 = vector.extract_strided_slice %1 {offsets = [0, 32], sizes = [2, 32], strides = [1, 1]} : vector<2x128xf32> to vector<2x32xf32>
    %cst_3 = arith.constant dense<0.000000e+00> : vector<2xf32>
    %8 = vector.multi_reduction <add>, %7, %cst_3 [1] : vector<2x32xf32> to vector<2xf32>
    %9 = vector.shape_cast %8 : vector<2xf32> to vector<2x1xf32>
    %10 = vector.shape_cast %9 : vector<2x1xf32> to vector<2x1xf32>
    %11 = vector.broadcast %10 : vector<2x1xf32> to vector<2x32xf32>
    %12 = vector.extract_strided_slice %1 {offsets = [0, 64], sizes = [2, 32], strides = [1, 1]} : vector<2x128xf32> to vector<2x32xf32>
    %cst_4 = arith.constant dense<0.000000e+00> : vector<2xf32>
    %13 = vector.multi_reduction <add>, %12, %cst_4 [1] : vector<2x32xf32> to vector<2xf32>
    %14 = vector.shape_cast %13 : vector<2xf32> to vector<2x1xf32>
    %15 = vector.shape_cast %14 : vector<2x1xf32> to vector<2x1xf32>
    %16 = vector.broadcast %15 : vector<2x1xf32> to vector<2x32xf32>
    %17 = vector.extract_strided_slice %1 {offsets = [0, 96], sizes = [2, 32], strides = [1, 1]} : vector<2x128xf32> to vector<2x32xf32>
    %cst_5 = arith.constant dense<0.000000e+00> : vector<2xf32>
    %18 = vector.multi_reduction <add>, %17, %cst_5 [1] : vector<2x32xf32> to vector<2xf32>
    %19 = vector.shape_cast %18 : vector<2xf32> to vector<2x1xf32>
    %20 = vector.shape_cast %19 : vector<2x1xf32> to vector<2x1xf32>
    %21 = vector.broadcast %20 : vector<2x1xf32> to vector<2x32xf32>
    %22 = tpu.concatenate %6, %11, %16, %21 in 1 : vector<2x32xf32>, vector<2x32xf32>, vector<2x32xf32>, vector<2x32xf32> -> vector<2x128xf32>
    %23 = vector.extract_strided_slice %0 {offsets = [0, 0], sizes = [2, 32], strides = [1, 1]} : vector<2x128xf32> to vector<2x32xf32>
    %cst_6 = arith.constant dense<0xFF800000> : vector<2xf32>
    %24 = vector.multi_reduction <maximumf>, %23, %cst_6 [1] : vector<2x32xf32> to vector<2xf32>
    %25 = vector.shape_cast %24 : vector<2xf32> to vector<2x1xf32>
    %26 = vector.shape_cast %25 : vector<2x1xf32> to vector<2x1xf32>
    %27 = vector.broadcast %26 : vector<2x1xf32> to vector<2x32xf32>
    %28 = vector.extract_strided_slice %0 {offsets = [0, 32], sizes = [2, 32], strides = [1, 1]} : vector<2x128xf32> to vector<2x32xf32>
    %cst_7 = arith.constant dense<0xFF800000> : vector<2xf32>
    %29 = vector.multi_reduction <maximumf>, %28, %cst_7 [1] : vector<2x32xf32> to vector<2xf32>
    %30 = vector.shape_cast %29 : vector<2xf32> to vector<2x1xf32>
    %31 = vector.shape_cast %30 : vector<2x1xf32> to vector<2x1xf32>
    %32 = vector.broadcast %31 : vector<2x1xf32> to vector<2x32xf32>
    %33 = vector.extract_strided_slice %0 {offsets = [0, 64], sizes = [2, 32], strides = [1, 1]} : vector<2x128xf32> to vector<2x32xf32>
    %cst_8 = arith.constant dense<0xFF800000> : vector<2xf32>
    %34 = vector.multi_reduction <maximumf>, %33, %cst_8 [1] : vector<2x32xf32> to vector<2xf32>
    %35 = vector.shape_cast %34 : vector<2xf32> to vector<2x1xf32>
    %36 = vector.shape_cast %35 : vector<2x1xf32> to vector<2x1xf32>
    %37 = vector.broadcast %36 : vector<2x1xf32> to vector<2x32xf32>
    %38 = vector.extract_strided_slice %0 {offsets = [0, 96], sizes = [2, 32], strides = [1, 1]} : vector<2x128xf32> to vector<2x32xf32>
    %cst_9 = arith.constant dense<0xFF800000> : vector<2xf32>
    %39 = vector.multi_reduction <maximumf>, %38, %cst_9 [1] : vector<2x32xf32> to vector<2xf32>
    %40 = vector.shape_cast %39 : vector<2xf32> to vector<2x1xf32>
    %41 = vector.shape_cast %40 : vector<2x1xf32> to vector<2x1xf32>
    %42 = vector.broadcast %41 : vector<2x1xf32> to vector<2x32xf32>
    %43 = tpu.concatenate %27, %32, %37, %42 in 1 : vector<2x32xf32>, vector<2x32xf32>, vector<2x32xf32>, vector<2x32xf32> -> vector<2x128xf32>
    %44 = arith.subf %0, %43 : vector<2x128xf32>
    %45 = math.exp %44 : vector<2x128xf32>
    %46 = vector.extract_strided_slice %45 {offsets = [0, 0], sizes = [2, 32], strides = [1, 1]} : vector<2x128xf32> to vector<2x32xf32>
    %cst_10 = arith.constant dense<0.000000e+00> : vector<2xf32>
    %47 = vector.multi_reduction <add>, %46, %cst_10 [1] : vector<2x32xf32> to vector<2xf32>
    %48 = vector.shape_cast %47 : vector<2xf32> to vector<2x1xf32>
    %49 = vector.shape_cast %48 : vector<2x1xf32> to vector<2x1xf32>
    %50 = vector.broadcast %49 : vector<2x1xf32> to vector<2x32xf32>
    %51 = vector.extract_strided_slice %45 {offsets = [0, 32], sizes = [2, 32], strides = [1, 1]} : vector<2x128xf32> to vector<2x32xf32>
    %cst_11 = arith.constant dense<0.000000e+00> : vector<2xf32>
    %52 = vector.multi_reduction <add>, %51, %cst_11 [1] : vector<2x32xf32> to vector<2xf32>
    %53 = vector.shape_cast %52 : vector<2xf32> to vector<2x1xf32>
    %54 = vector.shape_cast %53 : vector<2x1xf32> to vector<2x1xf32>
    %55 = vector.broadcast %54 : vector<2x1xf32> to vector<2x32xf32>
    %56 = vector.extract_strided_slice %45 {offsets = [0, 64], sizes = [2, 32], strides = [1, 1]} : vector<2x128xf32> to vector<2x32xf32>
    %cst_12 = arith.constant dense<0.000000e+00> : vector<2xf32>
    %57 = vector.multi_reduction <add>, %56, %cst_12 [1] : vector<2x32xf32> to vector<2xf32>
    %58 = vector.shape_cast %57 : vector<2xf32> to vector<2x1xf32>
    %59 = vector.shape_cast %58 : vector<2x1xf32> to vector<2x1xf32>
    %60 = vector.broadcast %59 : vector<2x1xf32> to vector<2x32xf32>
    %61 = vector.extract_strided_slice %45 {offsets = [0, 96], sizes = [2, 32], strides = [1, 1]} : vector<2x128xf32> to vector<2x32xf32>
    %cst_13 = arith.constant dense<0.000000e+00> : vector<2xf32>
    %62 = vector.multi_reduction <add>, %61, %cst_13 [1] : vector<2x32xf32> to vector<2xf32>
    %63 = vector.shape_cast %62 : vector<2xf32> to vector<2x1xf32>
    %64 = vector.shape_cast %63 : vector<2x1xf32> to vector<2x1xf32>
    %65 = vector.broadcast %64 : vector<2x1xf32> to vector<2x32xf32>
    %66 = tpu.concatenate %50, %55, %60, %65 in 1 : vector<2x32xf32>, vector<2x32xf32>, vector<2x32xf32>, vector<2x32xf32> -> vector<2x128xf32>
    %67 = math.log %66 : vector<2x128xf32>
    %cst_14 = arith.constant 0.000000e+00 : f32
    %68 = vector.broadcast %cst_14 : f32 to vector<2x128xf32>
    %69 = arith.cmpf oeq, %22, %68 : vector<2x128xf32>
    %cst_15 = arith.constant 9.99999997E-7 : f32
    %70 = vector.broadcast %cst_15 : f32 to vector<2x128xf32>
    %71 = arith.select %69, %70, %22 : vector<2x128xi1>, vector<2x128xf32>
    %72 = tpu.reciprocal %71 : vector<2x128xf32> -> vector<2x128xf32>
    %73 = arith.mulf %1, %72 : vector<2x128xf32>
    %74 = arith.subf %44, %67 : vector<2x128xf32>
    %cst_16 = arith.constant 0.000000e+00 : f32
    %75 = vector.broadcast %cst_16 : f32 to vector<2x128xf32>
    %76 = arith.cmpf ogt, %73, %75 : vector<2x128xf32>
    %cst_17 = arith.constant 1.000000e+00 : f32
    %77 = vector.broadcast %cst_17 : f32 to vector<2x128xf32>
    %78 = arith.select %76, %73, %77 : vector<2x128xi1>, vector<2x128xf32>
    %79 = math.log %78 : vector<2x128xf32>
    %80 = arith.subf %79, %74 : vector<2x128xf32>
    %81 = arith.mulf %73, %80 : vector<2x128xf32>
    %cst_18 = arith.constant 0.000000e+00 : f32
    %82 = vector.broadcast %cst_18 : f32 to vector<2x128xf32>
    %83 = arith.select %76, %81, %82 : vector<2x128xi1>, vector<2x128xf32>
    %cst_19 = arith.constant dense<0.000000e+00> : vector<2xf32>
    %84 = vector.multi_reduction <add>, %83, %cst_19 [1] : vector<2x128xf32> to vector<2xf32>
    %85 = vector.shape_cast %84 : vector<2xf32> to vector<2x1xf32>
    %86 = vector.shape_cast %85 : vector<2x1xf32> to vector<1x2x1xf32>
    %cst_20 = arith.constant dense<0.000000e+00> : vector<1xf32>
    %87 = vector.multi_reduction <add>, %86, %cst_20 [1, 2] : vector<1x2x1xf32> to vector<1xf32>
    %88 = vector.shape_cast %87 : vector<1xf32> to vector<1x1x1xf32>
    %89 = vector.extract %88[0, 0, 0] : f32 from vector<1x1x1xf32>
    %90 = tpu.iota {dimensions = array<i32: 0>} : vector<8x128xi32>
    %91 = tpu.iota {dimensions = array<i32: 1>} : vector<8x128xi32>
    %c0_i32 = arith.constant 0 : i32
    %92 = vector.broadcast %c0_i32 : i32 to vector<8x128xi32>
    %93 = arith.cmpi eq, %90, %92 : vector<8x128xi32>
    %c0_i32_21 = arith.constant 0 : i32
    %94 = vector.broadcast %c0_i32_21 : i32 to vector<8x128xi32>
    %95 = arith.cmpi eq, %91, %94 : vector<8x128xi32>
    %96 = arith.andi %93, %95 : vector<8x128xi1>
    %cst_22 = arith.constant 0.000000e+00 : f32
    %97 = vector.broadcast %89 : f32 to vector<8x128xf32>
    %98 = vector.broadcast %cst_22 : f32 to vector<8x128xf32>
    %99 = arith.select %96, %97, %98 : vector<8x128xi1>, vector<8x128xf32>
    %c0_23 = arith.constant 0 : index
    %c0_24 = arith.constant 0 : index
    %100 = vector.load %arg3[%c0_23, %c0_24] : memref<8x128xf32, #tpu.memory_space<vmem>>, vector<8x128xf32>
    tpu.vector_store %arg3[%c0_23, %c0_24], %99 {strides = array<i32>} : memref<8x128xf32, #tpu.memory_space<vmem>>, vector<8x128xf32>,
    return
  }
  func.func @transform_0(%arg0: i32) -> (i32, i32) {
    %c0_i32 = arith.constant 0 : i32
    %c0_i32_0 = arith.constant 0 : i32
    return %arg0, %c0_i32 : i32, i32
  }
  func.func @transform_1(%arg0: i32) -> (i32, i32) {
    %c0_i32 = arith.constant 0 : i32
    %c0_i32_0 = arith.constant 0 : i32
    return %arg0, %c0_i32 : i32, i32
  }
  func.func @transform_2(%arg0: i32) -> (i32, i32) {
    %c0_i32 = arith.constant 0 : i32
    %c0_i32_0 = arith.constant 0 : i32
    return %arg0, %c0_i32 : i32, i32
  }
}

</mosaic_0001>

<bundles_post_ra>
// kernel: tpu_custom_call.1
= control target key start
LH: loop header
LB: loop body
LE: loop exit
PB: predicated region body
PF: predicated region fallthrough
CT: control target
= control target key end

     0   :  { %7 = vsyncpa [#allocation3], 0  ;;  %s300_s0 = inlined_call_operand.hbm [shape: f32[2,128], index: 0, kind: input, shape index: {}]   ;;  %s301_s1 = inlined_call_operand.hbm [shape: f32[2,128], index: 1, kind: input, shape index: {}]   ;;  %s302_s2 = inlined_call_operand.hbm [shape: f32[8,128], index: 2, kind: output, shape index: {}]  }
   0x1   :  { %8 = vsyncpa [#allocation6], 0 }
   0x2   :  { %9 = vsyncpa [#allocation4], 0  ;;  %s250_s9 = smov [#allocation2]   ;;  %s251_s11 = smov [#allocation5]  }
   0x3   :  { %s16_s10 = sshll.u32 %s250_s9, 4  ;;  %s26_s12 = sshll.u32 %s251_s11, 4  ;;  %s17_s10 = int_to_ptr.vmem [resolvable:$true] %s16_s10  ;;  %s27_s12 = int_to_ptr.vmem [resolvable:$true] %s26_s12 }
   0x4   :  { %s192_s13 = scalar_lea.vmem %s17_s10, 32  ;;  %p197_p1 = scmp.lt.s32.totalorder %s17_s10, %s17_s10 }
   0x5   :  { %p193_p0 = scmp.ne.s32.totalorder %s17_s10, %s192_s13  ;;  %p198_p2 = scmp.lt.s32.totalorder %s192_s13, %s192_s13 }
   0x7   :  { %p199_p3 = por %p198_p2, %p197_p1 }
   0x9   :  { %p200_p4 = pnand %p199_p3, %p193_p0 }
   0xb   :  { %203 = shalt.err (!%p200_p4)
}
   0xc   :  { %19 = dma.hbm_to_vmem [thread:$0]  %s300_s0, 32, %s17_s10, [#allocation3]  }
   0xd   :  { %s212_s16 = scalar_lea.vmem %s27_s12, 32  ;;  %p217_p6 = scmp.lt.s32.totalorder %s27_s12, %s27_s12 }
   0xe   :  { %p213_p5 = scmp.ne.s32.totalorder %s27_s12, %s212_s16  ;;  %p218_p7 = scmp.lt.s32.totalorder %s212_s16, %s212_s16 }
  0x10   :  { %p219_p8 = por %p218_p7, %p217_p6 }
  0x12   :  { %p220_p9 = pnand %p219_p8, %p213_p5 }
  0x14   :  { %223 = shalt.err (!%p220_p9)
}
  0x15   :  { %29 = dma.hbm_to_vmem [thread:$0]  %s301_s1, 32, %s27_s12, [#allocation6]  }
  0x16   :  { %244 = dma.done.wait [#allocation3], 32  }
  0x17   :  { %245 = vsyncadd [#allocation3], 4294967264 }
  0x18   :  { %246 = dma.done.wait [#allocation6], 32  }
  0x19   :  { %247 = vsyncadd [#allocation6], 4294967264  ;;  %vm38_vm0 = vcmask 254976   ;;  %vm74_vm1 = vcmask 779776   ;;  %v36_v0 = vld [vmem:[#allocation2] sm:$0x3] }
  0x1a   :  { %vm70_vm2 = vcmask 517376   ;;  %vm78_vm3 = vcmask 1042176   ;;  %v67_v1 = vsel %vm38_vm0, %v36_v0, -inf  ;;  %v75_v2 = vsel %vm74_vm1, %v36_v0, -inf  ;;  %v37_v5 = vld [vmem:[#allocation5] sm:$0x3] }
  0x1b   :  { %68 = vmax.xlane.f32.xlu0 %v67_v1  ;;  %76 = vmax.xlane.f32.xlu1 %v75_v2  ;;  %v71_v3 = vsel %vm70_vm2, %v36_v0, -inf  ;;  %v79_v4 = vsel %vm78_vm3, %v36_v0, -inf  ;;  %s252_s0 = smov 64   ;;  %s253_s1 = smov 32   ;;  %vm61_vm4 = vcmask 261120   ;;  %vm63_vm5 = vcmask 523264  }
  0x1c   :  { %s254_s19 = smov 96   ;;  %vm65_vm6 = vcmask 785408   ;;  %v39_v17 = vsel %vm38_vm0, %v37_v5, 0.0  ;;  %vm127_vm9 = vcmask 1041408   ;;  %vm131_vm10 = vcmask 1024   ;;  %s255_s20 = smov [#allocation7]  }
  0x1d   :  { %v142_v2 = vlaneseq  ;;  %s158_s21 = sshll.u32 %s255_s20, 4  ;;  %s159_s21 = int_to_ptr.vmem [resolvable:$true] %s158_s21 }
  0x1e   :  { %s224_s23 = scalar_lea.vmem %s159_s21, 128  ;;  %p229_p11 = scmp.lt.s32.totalorder %s159_s21, %s159_s21 }
  0x1f   :  { %72 = vmax.xlane.f32.xlu0 %v71_v3  ;;  %80 = vmax.xlane.f32.xlu1 %v79_v4  ;;  %v143_v3 = vshrl.u32 %v142_v2, 7  ;;  %v145_v4 = vand.u32 127, %v142_v2  ;;  %p225_p10 = scmp.ne.s32.totalorder %s159_s21, %s224_s23  ;;  %p230_p12 = scmp.lt.s32.totalorder %s224_s23, %s224_s23 }
  0x21   :  { %vm146_vm11 = vcmp.eq.s32.totalorder %v143_v3, 0  ;;  %vm147_vm12 = vcmp.eq.s32.totalorder %v145_v4, 0  ;;  %p231_p13 = por %p230_p12, %p229_p11 }
  0x22   :  { %vm148_vm13 = vmand %vm146_vm11, %vm147_vm12 }
  0x23   :  { %p232_p0 = pnand %p231_p13, %p225_p10 }
  0x30   :  { %49 = vrot.lane.b32.xlu1 %v37_v5, %s252_s0 }
  0x34   :  { %55 = vrot.lane.b32.xlu1 %v37_v5, %s253_s1 }
  0x35   :  { %43 = vrot.lane.b32.xlu0 %v37_v5, %s254_s19 }
  0xa4   :  { %v69_v6 = vpop.xlane.xlu0 %68  ;;  %v77_v7 = vpop.xlane.xlu1 %76 }
  0xa8   :  { %v73_v8 = vpop.xlane.xlu0 %72  ;;  %v81_v9 = vpop.xlane.xlu1 %80 }
  0xa9   :  { %v82_v10 = vsel %vm61_vm4, %v69_v6, %v73_v8 }
  0xaa   :  { %v83_v11 = vsel %vm63_vm5, %v82_v10, %v77_v7 }
  0xab   :  { %v84_v12 = vsel %vm65_vm6, %v83_v11, %v81_v9 }
  0xac   :  { %v85_v13 = vsub.f32 %v36_v0, %v84_v12  ;;  %v50_v16 = vpop.permute.xlu1 %49  ;;  %v44_v20 = vpop.permute.xlu0 %43 }
  0xad   :  { %v52_v18 = vsel %vm38_vm0, %v50_v16, 0.0  ;;  %v46_v22 = vsel %vm38_vm0, %v44_v20, 0.0 }
  0xae   :  { %v86_v14 = vmul.f32 1.442695, %v85_v13 }
  0xb0   :  { %176 = vpow2.f32 %v86_v14  ;;  %v56_v19 = vpop.permute.xlu1 %55 }
  0xb1   :  { %v58_v21 = vsel %vm38_vm0, %v56_v19, 0.0 }
  0xbd   :  { %v177_v15 = vpop.eup %176 }
  0xbe   :  { %98 = vrot.lane.b32.xlu0 %v177_v15, %s252_s0  ;;  %92 = vrot.lane.b32.xlu1 %v177_v15, %s254_s19  ;;  %v88_v23 = vsel %vm38_vm0, %v177_v15, 0.0 }
  0xc2   :  { %104 = vrot.lane.b32.xlu1 %v177_v15, %s253_s1 }
  0xdd   :  { %40 = vadd.xlane.f32.xlu0 %v39_v17 }
  0xe1   :  { %53 = vadd.xlane.f32.xlu0 %v52_v18 }
  0xe5   :  { %59 = vadd.xlane.f32.xlu0 %v58_v21 }
  0xe6   :  { %47 = vadd.xlane.f32.xlu1 %v46_v22 }
  0xe9   :  { %89 = vadd.xlane.f32.xlu0 %v88_v23 }
 0x130   :  { %v93_v24 = vpop.permute.xlu1 %92  ;;  %v99_v25 = vpop.permute.xlu0 %98 }
 0x131   :  { %v95_v26 = vsel %vm38_vm0, %v93_v24, 0.0  ;;  %v101_v27 = vsel %vm38_vm0, %v99_v25, 0.0 }
 0x132   :  { %96 = vadd.xlane.f32.xlu1 %v95_v26  ;;  %102 = vadd.xlane.f32.xlu0 %v101_v27 }
 0x134   :  { %v105_v28 = vpop.permute.xlu1 %104 }
 0x135   :  { %v107_v29 = vsel %vm38_vm0, %v105_v28, 0.0 }
 0x136   :  { %108 = vadd.xlane.f32.xlu1 %v107_v29 }
 0x166   :  { %v41_v30 = vpop.xlane.xlu0 %40 }
 0x16a   :  { %v54_v32 = vpop.xlane.xlu0 %53 }
 0x16e   :  { %v60_v35 = vpop.xlane.xlu0 %59 }
 0x16f   :  { %v48_v31 = vpop.xlane.xlu1 %47 }
 0x170   :  { %v62_v33 = vsel %vm61_vm4, %v41_v30, %v48_v31 }
 0x171   :  { %v64_v34 = vsel %vm63_vm5, %v62_v33, %v54_v32 }
 0x172   :  { %v66_v36 = vsel %vm65_vm6, %v64_v34, %v60_v35  ;;  %v90_v40 = vpop.xlane.xlu0 %89 }
 0x173   :  { %vm115_vm7 = vcmp.eq.f32.partialorder %v66_v36, 0.0 }
 0x174   :  { %v116_v37 = vsel %vm115_vm7, 1e-06, %v66_v36 }
 0x175   :  { %178 = vrcp.f32 %v116_v37 }
 0x182   :  { %v179_v38 = vpop.eup %178 }
 0x183   :  { %v118_v39 = vmul.f32 %v179_v38, %v37_v5 }
 0x185   :  { %vm120_vm8 = vcmp.gt.f32.partialorder %v118_v39, 0.0 }
 0x186   :  { %v121_v44 = vsel %vm120_vm8, %v118_v39, 1.0 }
 0x187   :  { %180 = vlog2.f32 %v121_v44 }
 0x194   :  { %v181_v48 = vpop.eup %180 }
 0x195   :  { %v123_v52 = vmul.f32 0.6931472, %v181_v48 }
 0x1bb   :  { %v97_v41 = vpop.xlane.xlu1 %96  ;;  %v103_v43 = vpop.xlane.xlu0 %102 }
 0x1bc   :  { %v110_v42 = vsel %vm61_vm4, %v90_v40, %v97_v41 }
 0x1bd   :  { %v111_v45 = vsel %vm63_vm5, %v110_v42, %v103_v43 }
 0x1bf   :  { %v109_v46 = vpop.xlane.xlu1 %108 }
 0x1c0   :  { %v112_v47 = vsel %vm65_vm6, %v111_v45, %v109_v46 }
 0x1c1   :  { %182 = vlog2.f32 %v112_v47 }
 0x1ce   :  { %v183_v49 = vpop.eup %182 }
 0x1cf   :  { %v114_v50 = vmul.f32 0.6931472, %v183_v49 }
 0x1d1   :  { %v119_v51 = vsub.f32 %v85_v13, %v114_v50 }
 0x1d3   :  { %v124_v53 = vsub.f32 %v123_v52, %v119_v51 }
 0x1d5   :  { %v125_v54 = vmul.f32 %v124_v53, %v118_v39 }
 0x1d7   :  { %v126_v55 = vsel %vm120_vm8, %v125_v54, 0.0 }
 0x1d8   :  { %v128_v56 = vsel %vm127_vm9, %v126_v55, 0.0 }
 0x1d9   :  { %129 = vadd.xlane.f32.xlu0 %v128_v56 }
 0x262   :  { %v130_v57 = vpop.xlane.xlu0 %129 }
 0x263   :  { %v132_v58 = vsel %vm131_vm10, %v130_v57, 0.0 }
 0x264   :  { %133 = vadd.xlane.f32.xlu1 %v132_v58 }
 0x2ed   :  { %v134_v59 = vpop.xlane.xlu1 %133 }
 0x2ee   :  { %v135_v60 = vrot.slane %v134_v59, 4 }
 0x2f0   :  { %v136_v61 = vadd.f32 %v135_v60, %v134_v59 }
 0x2f2   :  { %v137_v62 = vrot.slane %v136_v61, 2 }
 0x2f4   :  { %v138_v63 = vadd.f32 %v137_v62, %v136_v61 }
 0x2f6   :  { %v139_v0 = vrot.slane %v138_v63, 1 }
 0x2f8   :  { %v140_v1 = vadd.f32 %v139_v0, %v138_v63 }
 0x2fa   :  { %168 = vpush %v140_v1 }
 0x32b   :  { %s169_s22 = spop %168 }
 0x32c   :  { %v149_v5 = vstv %s169_s22 }
 0x32d   :  { %v150_v6 = vsel %vm148_vm13, %v149_v5, 0.0 }
 0x32e   :  { %151 = vst [vmem:[#allocation7] sm:$0xff] %v150_v6 }
 0x32f   :  { %235 = shalt.err (!%p232_p0)
}
 0x330   :  { %161 = dma.vmem_to_hbm [thread:$0]  %s159_s21, 128, %s302_s2, [#allocation4]  }
 0x331   :  { %248 = dma.done.wait [#allocation4], 128  }
 0x332   :  { %249 = vsyncadd [#allocation4], 4294967168 }
 0x333   :  { %165 = vsyncpa [#allocation3], 1 }
 0x334   :  { %166 = vsyncpa [#allocation6], 1 }
 0x335   :  { %167 = vsyncpa [#allocation4], 1 }

</bundles_post_ra>
